<compile_context>
chip_gen: v7x
topology: tpu7x:2x2x1
jax: 0.10.0
libtpu: 0.0.40
codegen_flags: <defaults>
</compile_context>

<pallas_src>
import functools

import jax
import jax.numpy as jnp
from jax.experimental import pallas as pl
from jax.experimental.pallas import tpu as pltpu


def _round_up(n, m):
    return ((n + m - 1) // m) * m


# ----------------------------- Pallas kernel ------------------------------ #
def idnn_plus_ae_kernel(
    xf_ref,    # (TB, Dp)         full flattened input (compute dtype)
    wcat_ref,  # (Dp, 2*Hp + Mp)  [w1 (mid rows zeroed) | we | middle-frame selector]
    bcat_ref,  # (1, 2*Hp + Mp)   [b1 | be | 0]           (f32)
    w2_ref,    # (Hp, Mp)         IDNN output layer
    b2_ref,    # (1, Mp)          (f32)
    wd_ref,    # (Hp, Dp)         AE decoder
    bd_ref,    # (1, Dp)          (f32)
    out_ref,   # (TB, 2)          lane 0 = idnn_err, lane 1 = ae_err (f32)
    *,
    h_pad,     # padded hidden width (static)
    inv_m,     # 1 / true mel bins (static)
    inv_d,     # 1 / true flattened dim (static)
):
    xf = xf_ref[...]                      # keep storage dtype for the MXU

    # ---- fused first layer: IDNN hidden | AE hidden | middle-frame gather ----
    hz = jnp.dot(xf, wcat_ref[...], preferred_element_type=jnp.float32)
    hz = hz + bcat_ref[...]               # f32 bias; zero over the gather tail
    h = jnp.maximum(hz[:, :2 * h_pad], 0.0)   # 128-aligned slice, f32 ReLU
    h_idnn = h[:, :h_pad]
    z_ae = h[:, h_pad:]
    xm = hz[:, 2 * h_pad:]                # (TB, Mp) exact copy of the middle frame

    # ---- IDNN: predict middle frame, per-sample MSE over true M ----
    pred = jnp.dot(h_idnn.astype(w2_ref.dtype), w2_ref[...],
                   preferred_element_type=jnp.float32) + b2_ref[...]
    d_i = pred - xm                       # padded lanes are exactly 0
    idnn_err = jnp.sum(d_i * d_i, axis=-1, keepdims=True) * inv_m   # (TB, 1)

    # ---- AE: reconstruct full input, per-sample MSE over true D ----
    xhat = jnp.dot(z_ae.astype(wd_ref.dtype), wd_ref[...],
                   preferred_element_type=jnp.float32) + bd_ref[...]
    d_a = xhat - xf.astype(jnp.float32)   # padded lanes are exactly 0
    ae_err = jnp.sum(d_a * d_a, axis=-1, keepdims=True) * inv_d     # (TB, 1)

    # ---- 2-lane packed output: lane 0 = idnn, lane 1 = ae (8 B/sample) ----
    lane = jax.lax.broadcasted_iota(jnp.int32, out_ref.shape, 1)    # (TB, 2)
    out_ref[...] = jnp.where(lane == 0, idnn_err, ae_err)


# ------------------------------ JAX wrapper -------------------------------- #
def make_params(key, frames, mels, hidden):
    """Deterministic synthetic parameters (shapes implied by the module)."""
    d_ctx = (frames - 1) * mels
    d_full = frames * mels
    ks = jax.random.split(key, 4)
    scale = 0.1
    return {
        "w1": scale * jax.random.normal(ks[0], (d_ctx, hidden), jnp.float32),
        "b1": jnp.zeros((1, hidden), jnp.float32),
        "w2": scale * jax.random.normal(ks[1], (hidden, mels), jnp.float32),
        "b2": jnp.zeros((1, mels), jnp.float32),
        "we": scale * jax.random.normal(ks[2], (d_full, hidden), jnp.float32),
        "be": jnp.zeros((1, hidden), jnp.float32),
        "wd": scale * jax.random.normal(ks[3], (hidden, d_full), jnp.float32),
        "bd": jnp.zeros((1, d_full), jnp.float32),
    }


def idnn_plus_ae_forward(x, params, *, block_b=512,
                         compute_dtype=jnp.bfloat16, core_parallel=False):
    """x: (B, F, M) float. Returns (recon (B,), state dict).

    compute_dtype: storage/MXU operand dtype (bf16 default; halves HBM/VMEM
      traffic on this bandwidth-bound kernel).  Accumulation and the MSE
      epilogue are always f32.  Note: bf16 also quantizes the regression
      targets, so results differ from an f32 reference at ~bf16 precision.
    core_parallel: set True on v7x to shard batch tiles across its 2 TCs.
    """
    B, F, M = x.shape
    mid = F // 2
    D = F * M
    H = params["w1"].shape[1]

    # Lane-aligned padded dims.
    Dp = _round_up(D, 128)
    Mp = _round_up(M, 128)
    Hp = _round_up(H, 128)
    N1 = 2 * Hp + Mp                      # fused first-layer output width
    itemsize = jnp.dtype(compute_dtype).itemsize

    # ---- batch tile: count ALL resident VMEM (review fix) -----------------
    def vmem_need(tb_):
        w = 2 * (Dp * N1 + Hp * Mp + Hp * Dp) * itemsize   # weights, double-buffered
        b = 2 * 8 * (N1 + Mp + Dp) * 4                     # f32 biases (sublane-padded)
        xin = 2 * tb_ * Dp * itemsize                      # activation double-buffer
        outb = 2 * tb_ * 128 * 4                           # output tiles (lane-padded)
        f32_tmp = tb_ * (N1 + 2 * Mp + 2 * Dp) * 4         # hz, pred, xhat, residuals
        return w + b + xin + outb + f32_tmp

    VMEM_BUDGET = 40 << 20                # fits v7x 64 MiB physical with headroom
    tb = max(128, (min(block_b, 1024) // 128) * 128)
    while tb > 128 and vmem_need(tb) > VMEM_BUDGET:
        tb -= 128
    if B <= tb:                           # single tile covers the batch
        tb = max(8, _round_up(B, 8))
        Bp = tb
    else:
        Bp = _round_up(B, tb)
    grid = (Bp // tb,)
    vmem_limit = int(min(max(vmem_need(tb) + (8 << 20), 32 << 20), 64 << 20))

    # ---- inputs: only x_full; skip the padded copy when it's a no-op ------
    x_full = x.reshape(B, D)
    if Dp == D and Bp == B:
        xf_p = x_full.astype(compute_dtype)     # no zero-pad pass over HBM
    else:
        xf_p = jnp.zeros((Bp, Dp), compute_dtype).at[:B, :D].set(
            x_full.astype(compute_dtype))

    # ---- weight prep (one-time) --------------------------------------------
    def padw(a, r, c):                    # weights -> compute dtype, zero-padded
        return jnp.zeros((r, c), compute_dtype).at[:a.shape[0], :a.shape[1]].set(
            a.astype(compute_dtype))

    def padb(a, c):                       # biases stay f32 (tiny)
        return jnp.zeros((1, c), jnp.float32).at[:, :a.shape[1]].set(
            a.astype(jnp.float32))

    # Fold "remove middle frame" into w1 by inserting zero rows.
    w1 = params["w1"]                                    # (D_ctx, H)
    w1_full = jnp.zeros((D, H), w1.dtype)
    w1_full = w1_full.at[:mid * M, :].set(w1[:mid * M, :])
    w1_full = w1_full.at[(mid + 1) * M:, :].set(w1[mid * M:, :])

    # Middle-frame selection columns: S[mid*M + j, j] = 1  (exact gather on MXU).
    sel = jnp.zeros((D, M), jnp.float32).at[mid * M:(mid + 1) * M, :].set(
        jnp.eye(M, dtype=jnp.float32))

    w_cat = jnp.concatenate(
        [padw(w1_full, Dp, Hp), padw(params["we"], Dp, Hp), padw(sel, Dp, Mp)],
        axis=1)                                                         # (Dp, N1)
    b_cat = jnp.concatenate(
        [padb(params["b1"], Hp), padb(params["be"], Hp),
         jnp.zeros((1, Mp), jnp.float32)], axis=1)                      # (1, N1)
    w2_p = padw(params["w2"], Hp, Mp)
    b2_p = padb(params["b2"], Mp)
    wd_p = padw(params["wd"], Hp, Dp)
    bd_p = padb(params["bd"], Dp)

    batch_map = lambda i: (i, 0)
    const_map = lambda i: (0, 0)          # weights VMEM-resident across the grid

    in_specs = [
        pl.BlockSpec((tb, Dp), batch_map),
        pl.BlockSpec((Dp, N1), const_map),
        pl.BlockSpec((1, N1), const_map),
        pl.BlockSpec((Hp, Mp), const_map),
        pl.BlockSpec((1, Mp), const_map),
        pl.BlockSpec((Hp, Dp), const_map),
        pl.BlockSpec((1, Dp), const_map),
    ]
    out_spec = pl.BlockSpec((tb, 2), batch_map)   # 8 B/sample writeback

    flops = 2 * Bp * (Dp * N1 + Hp * (Mp + Dp))
    bytes_in = (xf_p.size * itemsize
                + (w_cat.size + w2_p.size + wd_p.size) * itemsize
                + (b_cat.size + b2_p.size + bd_p.size) * 4)
    bytes_out = Bp * 2 * 4
    cost = pl.CostEstimate(flops=flops, transcendentals=0,
                           bytes_accessed=bytes_in + bytes_out)

    if core_parallel and grid[0] >= 2:
        dims = (getattr(pltpu, "CORE_PARALLEL", "parallel"),)   # v7x: 2 TCs
    else:
        dims = ("parallel",)

    out = pl.pallas_call(
        functools.partial(idnn_plus_ae_kernel,
                          h_pad=Hp, inv_m=1.0 / M, inv_d=1.0 / D),
        out_shape=jax.ShapeDtypeStruct((Bp, 2), jnp.float32),
        grid=grid,
        in_specs=in_specs,
        out_specs=out_spec,
        compiler_params=pltpu.CompilerParams(
            dimension_semantics=dims,
            vmem_limit_bytes=vmem_limit),
        cost_estimate=cost,
    )(xf_p, w_cat, b_cat, w2_p, b2_p, wd_p, bd_p)

    idnn_err = out[:B, 0]
    ae_err = out[:B, 1]
    recon = idnn_err + ae_err
    state = {
        "recon": recon,
        # Matches the PyTorch module exactly: (per-sample error ** 2).mean().
        "idnn_recon": jnp.mean(idnn_err ** 2),
        "ae_recon": jnp.mean(ae_err ** 2),
    }
    return recon, state


# --------------------------- reference (pure JAX) --------------------------- #
def reference_forward(x, params):
    B, F, M = x.shape
    mid = F // 2
    x_mid = x[:, mid, :].reshape(B, M)
    x_ctx = jnp.concatenate([x[:, :mid, :], x[:, mid + 1:, :]], axis=1).reshape(B, -1)
    x_full = x.reshape(B, -1)
    h = jnp.maximum(x_ctx @ params["w1"] + params["b1"], 0.0)
    pred = h @ params["w2"] + params["b2"]
    idnn_err = jnp.mean((pred - x_mid) ** 2, axis=-1)
    z = jnp.maximum(x_full @ params["we"] + params["be"], 0.0)
    xhat = z @ params["wd"] + params["bd"]
    ae_err = jnp.mean((xhat - x_full) ** 2, axis=-1)
    return idnn_err + ae_err


if __name__ == "__main__":
    B, F, M, H = 2, 5, 16, 32  # batch, frames, mel-bins, hidden

    key = jax.random.PRNGKey(0)
    kx, kp = jax.random.split(key)
    x = jax.random.normal(kx, (B, F, M), jnp.float32)
    params = make_params(kp, F, M, H)

    ref = reference_forward(x, params)

    # Exact-path check (f32 operands): must match the f32 reference tightly.
    recon_f32, _ = idnn_plus_ae_forward(x, params, compute_dtype=jnp.float32)
    recon_f32 = jax.block_until_ready(recon_f32)
    assert recon_f32.shape == (B,)
    assert jnp.allclose(recon_f32, ref, atol=1e-4, rtol=1e-4), (recon_f32, ref)

    # Default bf16 path: operands and targets are bf16-quantized, so compare
    # with a deliberately loosened tolerance (review correctness note).
    recon_bf16, state = idnn_plus_ae_forward(x, params)
    recon_bf16 = jax.block_until_ready(recon_bf16)
    assert recon_bf16.shape == (B,)
    assert jnp.allclose(recon_bf16, ref, atol=5e-2, rtol=5e-2), (recon_bf16, ref)

    print("KERNEL_OK")
</pallas_src>

<mosaic_0001>
module attributes {stable_mosaic.version = 11 : i64} {
  func.func @idnn_plus_ae_kernel(%arg0: i32, %arg1: memref<8x128xf32, #tpu.memory_space<vmem>>, %arg2: memref<128x384xf32, #tpu.memory_space<vmem>>, %arg3: memref<1x384xf32, #tpu.memory_space<vmem>>, %arg4: memref<128x128xf32, #tpu.memory_space<vmem>>, %arg5: memref<1x128xf32, #tpu.memory_space<vmem>>, %arg6: memref<128x128xf32, #tpu.memory_space<vmem>>, %arg7: memref<1x128xf32, #tpu.memory_space<vmem>>, %arg8: memref<8x2xf32, #tpu.memory_space<vmem>>) attributes {dimension_semantics = [#tpu.dimension_semantics<parallel>], iteration_bounds = array<i64: 1>, scalar_prefetch = 0 : i64, scratch_operands = 0 : i64, tpu.core_type = #tpu.core_type<tc>, window_params = [{transform_indices = @transform_0, window_bounds = array<i64: 8, 128>}, {pipeline_mode = #tpu.pipeline_mode<synchronous>, transform_indices = @transform_1, window_bounds = array<i64: 128, 384>}, {pipeline_mode = #tpu.pipeline_mode<synchronous>, transform_indices = @transform_2, window_bounds = array<i64: 1, 384>}, {pipeline_mode = #tpu.pipeline_mode<synchronous>, transform_indices = @transform_3, window_bounds = array<i64: 128, 128>}, {pipeline_mode = #tpu.pipeline_mode<synchronous>, transform_indices = @transform_4, window_bounds = array<i64: 1, 128>}, {pipeline_mode = #tpu.pipeline_mode<synchronous>, transform_indices = @transform_5, window_bounds = array<i64: 128, 128>}, {pipeline_mode = #tpu.pipeline_mode<synchronous>, transform_indices = @transform_6, window_bounds = array<i64: 1, 128>}, {transform_indices = @transform_7, window_bounds = array<i64: 8, 2>}]} {
    %c0 = arith.constant 0 : index
    %c0_0 = arith.constant 0 : index
    %0 = vector.load %arg1[%c0, %c0_0] : memref<8x128xf32, #tpu.memory_space<vmem>>, vector<8x128xf32>
    %c0_1 = arith.constant 0 : index
    %c0_2 = arith.constant 0 : index
    %1 = vector.load %arg2[%c0_1, %c0_2] : memref<128x384xf32, #tpu.memory_space<vmem>>, vector<128x384xf32>
    %cst = arith.constant dense<0.000000e+00> : vector<8x384xf32>
    %2 = tpu.matmul %0, %1, %cst {dimension_numbers = #tpu.dot_dimension_numbers<[1], [0], [0], [1], [0, 0, 1, 1], [], []>} : vector<8x128xf32>, vector<128x384xf32>, vector<8x384xf32> -> vector<8x384xf32>
    %c0_3 = arith.constant 0 : index
    %c0_4 = arith.constant 0 : index
    %3 = vector.load %arg3[%c0_3, %c0_4] : memref<1x384xf32, #tpu.memory_space<vmem>>, vector<1x384xf32>
    %4 = vector.broadcast %3 : vector<1x384xf32> to vector<8x384xf32>
    %5 = arith.addf %2, %4 : vector<8x384xf32>
    %6 = vector.extract_strided_slice %5 {offsets = [0, 0], sizes = [8, 256], strides = [1, 1]} : vector<8x384xf32> to vector<8x256xf32>
    %cst_5 = arith.constant 0.000000e+00 : f32
    %7 = vector.broadcast %cst_5 : f32 to vector<8x256xf32>
    %8 = arith.maximumf %6, %7 : vector<8x256xf32>
    %9 = vector.extract_strided_slice %8 {offsets = [0, 0], sizes = [8, 128], strides = [1, 1]} : vector<8x256xf32> to vector<8x128xf32>
    %10 = vector.extract_strided_slice %8 {offsets = [0, 128], sizes = [8, 128], strides = [1, 1]} : vector<8x256xf32> to vector<8x128xf32>
    %11 = vector.extract_strided_slice %5 {offsets = [0, 256], sizes = [8, 128], strides = [1, 1]} : vector<8x384xf32> to vector<8x128xf32>
    %c0_6 = arith.constant 0 : index
    %c0_7 = arith.constant 0 : index
    %12 = vector.load %arg4[%c0_6, %c0_7] : memref<128x128xf32, #tpu.memory_space<vmem>>, vector<128x128xf32>
    %cst_8 = arith.constant dense<0.000000e+00> : vector<8x128xf32>
    %13 = tpu.matmul %9, %12, %cst_8 {dimension_numbers = #tpu.dot_dimension_numbers<[1], [0], [0], [1], [0, 0, 1, 1], [], []>} : vector<8x128xf32>, vector<128x128xf32>, vector<8x128xf32> -> vector<8x128xf32>
    %c0_9 = arith.constant 0 : index
    %c0_10 = arith.constant 0 : index
    %14 = vector.load %arg5[%c0_9, %c0_10] : memref<1x128xf32, #tpu.memory_space<vmem>>, vector<1x128xf32>
    %15 = vector.broadcast %14 : vector<1x128xf32> to vector<8x128xf32>
    %16 = arith.addf %13, %15 : vector<8x128xf32>
    %17 = arith.subf %16, %11 : vector<8x128xf32>
    %18 = arith.mulf %17, %17 : vector<8x128xf32>
    %cst_11 = arith.constant dense<0.000000e+00> : vector<8xf32>
    %19 = vector.multi_reduction <add>, %18, %cst_11 [1] : vector<8x128xf32> to vector<8xf32>
    %20 = vector.shape_cast %19 : vector<8xf32> to vector<8x1xf32>
    %cst_12 = arith.constant 6.250000e-02 : f32
    %21 = vector.broadcast %cst_12 : f32 to vector<8x1xf32>
    %22 = arith.mulf %20, %21 : vector<8x1xf32>
    %c0_13 = arith.constant 0 : index
    %c0_14 = arith.constant 0 : index
    %23 = vector.load %arg6[%c0_13, %c0_14] : memref<128x128xf32, #tpu.memory_space<vmem>>, vector<128x128xf32>
    %cst_15 = arith.constant dense<0.000000e+00> : vector<8x128xf32>
    %24 = tpu.matmul %10, %23, %cst_15 {dimension_numbers = #tpu.dot_dimension_numbers<[1], [0], [0], [1], [0, 0, 1, 1], [], []>} : vector<8x128xf32>, vector<128x128xf32>, vector<8x128xf32> -> vector<8x128xf32>
    %c0_16 = arith.constant 0 : index
    %c0_17 = arith.constant 0 : index
    %25 = vector.load %arg7[%c0_16, %c0_17] : memref<1x128xf32, #tpu.memory_space<vmem>>, vector<1x128xf32>
    %26 = vector.broadcast %25 : vector<1x128xf32> to vector<8x128xf32>
    %27 = arith.addf %24, %26 : vector<8x128xf32>
    %28 = arith.subf %27, %0 : vector<8x128xf32>
    %29 = arith.mulf %28, %28 : vector<8x128xf32>
    %cst_18 = arith.constant dense<0.000000e+00> : vector<8xf32>
    %30 = vector.multi_reduction <add>, %29, %cst_18 [1] : vector<8x128xf32> to vector<8xf32>
    %31 = vector.shape_cast %30 : vector<8xf32> to vector<8x1xf32>
    %cst_19 = arith.constant 1.250000e-02 : f32
    %32 = vector.broadcast %cst_19 : f32 to vector<8x1xf32>
    %33 = arith.mulf %31, %32 : vector<8x1xf32>
    %34 = tpu.iota {dimensions = array<i32: 1>} : vector<8x2xi32>
    %c0_i32 = arith.constant 0 : i32
    %35 = vector.broadcast %c0_i32 : i32 to vector<8x2xi32>
    %36 = arith.cmpi eq, %34, %35 : vector<8x2xi32>
    %37 = vector.shape_cast %22 : vector<8x1xf32> to vector<8x1xf32>
    %38 = vector.broadcast %37 : vector<8x1xf32> to vector<8x2xf32>
    %39 = vector.shape_cast %33 : vector<8x1xf32> to vector<8x1xf32>
    %40 = vector.broadcast %39 : vector<8x1xf32> to vector<8x2xf32>
    %41 = arith.select %36, %38, %40 : vector<8x2xi1>, vector<8x2xf32>
    %c0_20 = arith.constant 0 : index
    %c0_21 = arith.constant 0 : index
    %42 = vector.load %arg8[%c0_20, %c0_21] : memref<8x2xf32, #tpu.memory_space<vmem>>, vector<8x2xf32>
    tpu.vector_store %arg8[%c0_20, %c0_21], %41 {strides = array<i32>} : memref<8x2xf32, #tpu.memory_space<vmem>>, vector<8x2xf32>,
    return
  }
  func.func @transform_0(%arg0: i32) -> (i32, i32) {
    %c0_i32 = arith.constant 0 : i32
    %c0_i32_0 = arith.constant 0 : i32
    return %arg0, %c0_i32 : i32, i32
  }
  func.func @transform_1(%arg0: i32) -> (i32, i32) {
    %c0_i32 = arith.constant 0 : i32
    %c0_i32_0 = arith.constant 0 : i32
    %c0_i32_1 = arith.constant 0 : i32
    return %c0_i32, %c0_i32_0 : i32, i32
  }
  func.func @transform_2(%arg0: i32) -> (i32, i32) {
    %c0_i32 = arith.constant 0 : i32
    %c0_i32_0 = arith.constant 0 : i32
    %c0_i32_1 = arith.constant 0 : i32
    return %c0_i32, %c0_i32_0 : i32, i32
  }
  func.func @transform_3(%arg0: i32) -> (i32, i32) {
    %c0_i32 = arith.constant 0 : i32
    %c0_i32_0 = arith.constant 0 : i32
    %c0_i32_1 = arith.constant 0 : i32
    return %c0_i32, %c0_i32_0 : i32, i32
  }
  func.func @transform_4(%arg0: i32) -> (i32, i32) {
    %c0_i32 = arith.constant 0 : i32
    %c0_i32_0 = arith.constant 0 : i32
    %c0_i32_1 = arith.constant 0 : i32
    return %c0_i32, %c0_i32_0 : i32, i32
  }
  func.func @transform_5(%arg0: i32) -> (i32, i32) {
    %c0_i32 = arith.constant 0 : i32
    %c0_i32_0 = arith.constant 0 : i32
    %c0_i32_1 = arith.constant 0 : i32
    return %c0_i32, %c0_i32_0 : i32, i32
  }
  func.func @transform_6(%arg0: i32) -> (i32, i32) {
    %c0_i32 = arith.constant 0 : i32
    %c0_i32_0 = arith.constant 0 : i32
    %c0_i32_1 = arith.constant 0 : i32
    return %c0_i32, %c0_i32_0 : i32, i32
  }
  func.func @transform_7(%arg0: i32) -> (i32, i32) {
    %c0_i32 = arith.constant 0 : i32
    %c0_i32_0 = arith.constant 0 : i32
    return %arg0, %c0_i32 : i32, i32
  }
}

</mosaic_0001>

<bundles_post_ra>
// kernel: tpu_custom_call.1
= control target key start
LH: loop header
LB: loop body
LE: loop exit
PB: predicated region body
PF: predicated region fallthrough
CT: control target
= control target key end

     0   :  { %12 = vsyncpa [#allocation3], 0  ;;  %s1011_s0 = inlined_call_operand.hbm [shape: f32[8,128], index: 0, kind: input, shape index: {}]   ;;  %s1012_s1 = inlined_call_operand.hbm [shape: f32[128,384], index: 1, kind: input, shape index: {}]   ;;  %s1013_s2 = inlined_call_operand.vmem [shape: f32[1,384], index: 2, kind: input, shape index: {}]   ;;  %s1014_s3 = inlined_call_operand.hbm [shape: f32[128,128], index: 3, kind: input, shape index: {}]   ;;  %s1015_s4 = inlined_call_operand.vmem [shape: f32[1,128], index: 4, kind: input, shape index: {}]   ;;  %s1016_s5 = inlined_call_operand.hbm [shape: f32[128,128], index: 5, kind: input, shape index: {}]   ;;  %s1017_s6 = inlined_call_operand.vmem [shape: f32[1,128], index: 6, kind: input, shape index: {}]   ;;  %s1018_s7 = inlined_call_operand.vmem [shape: f32[8,2], index: 7, kind: output, shape index: {}]  }
   0x1   :  { %13 = vsyncpa [#allocation5], 0 }
   0x2   :  { %14 = vsyncpa [#allocation8], 0  ;;  %s864_s24 = smov [#allocation4]   ;;  %s770_s28 = scalar_lea.hbm %s1012_s1, 6144 }
   0x3   :  { %s30_s25 = sshll.u32 %s864_s24, 4  ;;  %p771_p0 = scmp.ne.s32.totalorder %s1012_s1, %s770_s28  ;;  %s31_s25 = int_to_ptr.vmem [resolvable:$true] %s30_s25 }
   0x4   :  { %p774_p1 = scmp.lt.u32.totalorder %s770_s28, %s1012_s1 }
   0x6   :  { %p776_p2 = pnand %p774_p1, %p771_p0 }
   0x8   :  { %779 = shalt.err (!%p776_p2)
}
   0x9   :  { %s780_s10 = scalar_lea.vmem %s31_s25, 6144  ;;  %p785_p4 = scmp.lt.s32.totalorder %s31_s25, %s31_s25 }
   0xa   :  { %p781_p3 = scmp.ne.s32.totalorder %s31_s25, %s780_s10  ;;  %p786_p5 = scmp.lt.s32.totalorder %s780_s10, %s780_s10 }
   0xc   :  { %p787_p6 = por %p786_p5, %p785_p4 }
   0xe   :  { %p788_p7 = pnand %p787_p6, %p781_p3 }
  0x10   :  { %791 = shalt.err (!%p788_p7)
}
  0x11   :  { %s865_s11 = smov 384   ;;  %s866_s12 = smov 24  }
  0x12   :  { %36 = dma.hbm_to_vmem [thread:$0]  %s1012_s1, 6144, %s31_s25, [#allocation5], %s865_s11, %s865_s11, %s866_s12  }
  0x13   :  { %s867_s15 = smov [#allocation2]   ;;  %s868_s17 = smov [#allocation6]  }
  0x14   :  { %s21_s16 = sshll.u32 %s867_s15, 4  ;;  %s44_s18 = sshll.u32 %s868_s17, 4  ;;  %s22_s16 = int_to_ptr.vmem [resolvable:$true] %s21_s16  ;;  %s45_s18 = int_to_ptr.vmem [resolvable:$true] %s44_s18 }
  0x15   :  { %s792_s21 = scalar_lea.hbm %s1011_s0, 128 }
  0x16   :  { %p793_p8 = scmp.ne.s32.totalorder %s1011_s0, %s792_s21  ;;  %p796_p9 = scmp.lt.u32.totalorder %s792_s21, %s1011_s0 }
  0x18   :  { %p798_p10 = pnand %p796_p9, %p793_p8 }
  0x1a   :  { %801 = shalt.err (!%p798_p10)
}
  0x1b   :  { %s802_s1 = scalar_lea.vmem %s22_s16, 128  ;;  %p807_p12 = scmp.lt.s32.totalorder %s22_s16, %s22_s16 }
  0x1c   :  { %p803_p11 = scmp.ne.s32.totalorder %s22_s16, %s802_s1  ;;  %p808_p13 = scmp.lt.s32.totalorder %s802_s1, %s802_s1 }
  0x1e   :  { %p809_p0 = por %p808_p13, %p807_p12 }
  0x20   :  { %p810_p1 = pnand %p809_p0, %p803_p11 }
  0x22   :  { %813 = shalt.err (!%p810_p1)
}
  0x23   :  { %24 = dma.hbm_to_vmem [thread:$0]  %s1011_s0, 128, %s22_s16, [#allocation3]  }
  0x24   :  { %s814_s30 = scalar_lea.hbm %s1014_s3, 2048 }
  0x25   :  { %p815_p2 = scmp.ne.s32.totalorder %s1014_s3, %s814_s30  ;;  %p818_p3 = scmp.lt.u32.totalorder %s814_s30, %s1014_s3 }
  0x27   :  { %p820_p4 = pnand %p818_p3, %p815_p2 }
  0x29   :  { %823 = shalt.err (!%p820_p4)
}
  0x2a   :  { %s824_s12 = scalar_lea.vmem %s45_s18, 2048  ;;  %p829_p6 = scmp.lt.s32.totalorder %s45_s18, %s45_s18 }
  0x2b   :  { %p825_p5 = scmp.ne.s32.totalorder %s45_s18, %s824_s12  ;;  %p830_p7 = scmp.lt.s32.totalorder %s824_s12, %s824_s12 }
  0x2d   :  { %p831_p8 = por %p830_p7, %p829_p6 }
  0x2f   :  { %p832_p9 = pnand %p831_p8, %p825_p5 }
  0x31   :  { %835 = shalt.err (!%p832_p9)
}
  0x32   :  { %s869_s0 = smov 128   ;;  %s870_s13 = smov 8  }
  0x33   :  { %50 = dma.hbm_to_vmem [thread:$0]  %s1014_s3, 2048, %s45_s18, [#allocation5], %s869_s0, %s869_s0, %s870_s13  }
  0x34   :  { %s871_s16 = smov [#allocation7]   ;;  %s836_s21 = scalar_lea.hbm %s1016_s5, 2048 }
  0x35   :  { %s58_s17 = sshll.u32 %s871_s16, 4  ;;  %p837_p10 = scmp.ne.s32.totalorder %s1016_s5, %s836_s21  ;;  %s59_s17 = int_to_ptr.vmem [resolvable:$true] %s58_s17 }
  0x36   :  { %p840_p11 = scmp.lt.u32.totalorder %s836_s21, %s1016_s5 }
  0x38   :  { %p842_p12 = pnand %p840_p11, %p837_p10 }
  0x3a   :  { %845 = shalt.err (!%p842_p12)
}
  0x3b   :  { %s846_s1 = scalar_lea.vmem %s59_s17, 2048  ;;  %p851_p0 = scmp.lt.s32.totalorder %s59_s17, %s59_s17 }
  0x3c   :  { %p847_p13 = scmp.ne.s32.totalorder %s59_s17, %s846_s1  ;;  %p852_p1 = scmp.lt.s32.totalorder %s846_s1, %s846_s1 }
  0x3e   :  { %p853_p2 = por %p852_p1, %p851_p0 }
  0x40   :  { %p854_p3 = pnand %p853_p2, %p847_p13 }
  0x42   :  { %857 = shalt.err (!%p854_p3)
}
  0x43   :  { %64 = dma.hbm_to_vmem [thread:$0]  %s1016_s5, 2048, %s59_s17, [#allocation8], %s869_s0, %s869_s0, %s870_s13  }
  0x44   :  { %858 = dma.done.wait [#allocation3], 128  }
  0x45   :  { %859 = vsyncadd [#allocation3], 4294967168 }
  0x46   :  { %860 = dma.done.wait [#allocation5], 8192  }
  0x47   :  { %861 = vsyncadd [#allocation5], 4294959104 }
  0x48   :  { %862 = dma.done.wait [#allocation8], 2048  }
  0x49   :  { %863 = vsyncadd [#allocation8], 4294965248  ;;  %v872_v0 = vmov 0.0   ;;  %v873_v1 = vmov 0.0|0.0   ;;  %vm874_vm0 = vmmov 0   ;;  %v81_v2 = vld [vmem:[#allocation4 + $0x8] sm:$0xff] }
  0x4a   :  { %209 = vmatprep.mubr.f32.mxu0 %v872_v0  ;;  %687 = vmatprep.subr.bf16.mxu1 %v873_v1  ;;  %v84_v3 = vld [vmem:[#allocation4 + $0x20] sm:$0xff]  ;;  %v83_v6 = vld [vmem:[#allocation4 + $0x18] sm:$0xff]  ;;  %v90_v8 = vld [vmem:[#allocation4 + $0x50] sm:$0xff]  ;;  %vm488_vm2 = vcmask 15360  }
  0x4b   :  { %582 = vmatprep.mubr.msk.f32.mxu1 %vm874_vm0, %v872_v0  ;;  %v80_v4 = vld [vmem:[#allocation4] sm:$0xff]  ;;  %v655_v5 = vpack.c.bf16 %v84_v3, %v81_v2  ;;  %v87_v7 = vld [vmem:[#allocation4 + $0x38] sm:$0xff]  ;;  %v86_v11 = vld [vmem:[#allocation4 + $0x30] sm:$0xff] }
  0x4c   :  { %v657_v9 = vpack.c.bf16 %v83_v6, %v80_v4  ;;  %v659_v10 = vpack.c.bf16 %v90_v8, %v87_v7  ;;  %v89_v12 = vld [vmem:[#allocation4 + $0x48] sm:$0xff]  ;;  %v96_v14 = vld [vmem:[#allocation4 + $0x80] sm:$0xff]  ;;  %v95_v18 = vld [vmem:[#allocation4 + $0x78] sm:$0xff] }
  0x4d   :  { %v93_v13 = vld [vmem:[#allocation4 + $0x68] sm:$0xff]  ;;  %656 = vmatprep.subr.bf16.mxu0 %v655_v5  ;;  %v661_v15 = vpack.c.bf16 %v89_v12, %v86_v11  ;;  %v92_v17 = vld [vmem:[#allocation4 + $0x60] sm:$0xff]  ;;  %v99_v19 = vld [vmem:[#allocation4 + $0x98] sm:$0xff] }
  0x4e   :  { %658 = vmatpush1.bf16.msra.mxu0 %v657_v9  ;;  %v663_v16 = vpack.c.bf16 %v96_v14, %v93_v13  ;;  %v102_v20 = vld [vmem:[#allocation4 + $0xb0] sm:$0xff]  ;;  %v665_v21 = vpack.c.bf16 %v95_v18, %v92_v17  ;;  %v101_v24 = vld [vmem:[#allocation4 + $0xa8] sm:$0xff]  ;;  %v108_v26 = vld [vmem:[#allocation4 + $0xe0] sm:$0xff] }
  0x4f   :  { %660 = vmatprep.subr.bf16.mxu0 %v659_v10  ;;  %v667_v22 = vpack.c.bf16 %v102_v20, %v99_v19  ;;  %v98_v23 = vld [vmem:[#allocation4 + $0x90] sm:$0xff]  ;;  %v105_v25 = vld [vmem:[#allocation4 + $0xc8] sm:$0xff]  ;;  %v88_v29 = vld [vmem:[#allocation4 + $0x40] sm:$0xff] }
  0x50   :  { %v82_v27 = vld [vmem:[#allocation4 + $0x10] sm:$0xff]  ;;  %v85_v28 = vld [vmem:[#allocation4 + $0x28] sm:$0xff]  ;;  %v669_v30 = vpack.c.bf16 %v101_v24, %v98_v23  ;;  %v91_v32 = vld [vmem:[#allocation4 + $0x58] sm:$0xff]  ;;  %v671_v33 = vpack.c.bf16 %v108_v26, %v105_v25 }
  0x51   :  { %v688_v31 = vpack.c.bf16 %v85_v28, %v82_v27  ;;  %v104_v34 = vld [vmem:[#allocation4 + $0xc0] sm:$0xff]  ;;  %v107_v35 = vld [vmem:[#allocation4 + $0xd8] sm:$0xff]  ;;  %v114_v37 = vld [vmem:[#allocation4 + $0x110] sm:$0xff]  ;;  %v691_v38 = vpack.c.bf16 %v91_v32, %v88_v29 }
  0x52   :  { %662 = vmatpush1.bf16.msra.mxu0 %v661_v15  ;;  %v111_v36 = vld [vmem:[#allocation4 + $0xf8] sm:$0xff]  ;;  %v94_v39 = vld [vmem:[#allocation4 + $0x70] sm:$0xff]  ;;  %v97_v40 = vld [vmem:[#allocation4 + $0x88] sm:$0xff]  ;;  %v673_v41 = vpack.c.bf16 %v107_v35, %v104_v34 }
  0x53   :  { %664 = vmatprep.subr.bf16.mxu0 %v663_v16  ;;  %689 = vmatpush3.bf16.msra.mxu1 %v688_v31  ;;  %v675_v42 = vpack.c.bf16 %v114_v37, %v111_v36  ;;  %v110_v43 = vld [vmem:[#allocation4 + $0xf0] sm:$0xff]  ;;  %v113_v44 = vld [vmem:[#allocation4 + $0x108] sm:$0xff]  ;;  %v120_v46 = vld [vmem:[#allocation4 + $0x140] sm:$0xff]  ;;  %v694_v47 = vpack.c.bf16 %v97_v40, %v94_v39 }
  0x54   :  { %690 = vmatprep.subr.bf16.mxu1 %v873_v1  ;;  %v117_v45 = vld [vmem:[#allocation4 + $0x128] sm:$0xff]  ;;  %v100_v48 = vld [vmem:[#allocation4 + $0xa0] sm:$0xff]  ;;  %v103_v49 = vld [vmem:[#allocation4 + $0xb8] sm:$0xff]  ;;  %v677_v50 = vpack.c.bf16 %v113_v44, %v110_v43 }
  0x55   :  { %v679_v51 = vpack.c.bf16 %v120_v46, %v117_v45  ;;  %v116_v52 = vld [vmem:[#allocation4 + $0x120] sm:$0xff]  ;;  %v119_v53 = vld [vmem:[#allocation4 + $0x138] sm:$0xff]  ;;  %v126_v55 = vld [vmem:[#allocation4 + $0x170] sm:$0xff]  ;;  %v697_v56 = vpack.c.bf16 %v103_v49, %v100_v48 }
  0x56   :  { %666 = vmatpush1.bf16.msra.mxu0 %v665_v21  ;;  %v123_v54 = vld [vmem:[#allocation4 + $0x158] sm:$0xff]  ;;  %v106_v57 = vld [vmem:[#allocation4 + $0xd0] sm:$0xff]  ;;  %v109_v58 = vld [vmem:[#allocation4 + $0xe8] sm:$0xff]  ;;  %v681_v59 = vpack.c.bf16 %v119_v53, %v116_v52 }
  0x57   :  { %668 = vmatprep.subr.bf16.mxu0 %v667_v22  ;;  %692 = vmatpush3.bf16.msra.mxu1 %v691_v38  ;;  %v683_v60 = vpack.c.bf16 %v126_v55, %v123_v54  ;;  %v122_v61 = vld [vmem:[#allocation4 + $0x150] sm:$0xff]  ;;  %v125_v62 = vld [vmem:[#allocation4 + $0x168] sm:$0xff]  ;;  %v700_v63 = vpack.c.bf16 %v109_v58, %v106_v57  ;;  %v112_v2 = vld [vmem:[#allocation4 + $0x100] sm:$0xff] }
  0x58   :  { %693 = vmatprep.subr.bf16.mxu1 %v873_v1  ;;  %v115_v3 = vld [vmem:[#allocation4 + $0x118] sm:$0xff]  ;;  %v685_v4 = vpack.c.bf16 %v125_v62, %v122_v61  ;;  %v288_v5 = vld [vmem:[#allocation6] sm:$0xff]  ;;  %v289_v6 = vld [vmem:[#allocation6 + $0x8] sm:$0xff] }
  0x59   :  { %v703_v7 = vpack.c.bf16 %v115_v3, %v112_v2  ;;  %v118_v8 = vld [vmem:[#allocation4 + $0x130] sm:$0xff]  ;;  %v121_v9 = vld [vmem:[#allocation4 + $0x148] sm:$0xff]  ;;  %v972_v10 = vld [vmem:[#allocation2] sm:$0xff]  ;;  %v712_v11 = vpack.c.bf16 %v289_v6, %v288_v5 }
  0x5a   :  { %670 = vmatpush1.bf16.msra.mxu0 %v669_v30  ;;  %v290_v12 = vld [vmem:[#allocation6 + $0x10] sm:$0xff]  ;;  %v291_v13 = vld [vmem:[#allocation6 + $0x18] sm:$0xff]  ;;  %v706_v14 = vpack.c.bf16 %v121_v9, %v118_v8  ;;  %v124_v15 = vld [vmem:[#allocation4 + $0x160] sm:$0xff] }
  0x5b   :  { %672 = vmatprep.subr.bf16.mxu0 %v671_v33  ;;  %695 = vmatpush3.bf16.msra.mxu1 %v694_v47  ;;  %v127_v16 = vld [vmem:[#allocation4 + $0x178] sm:$0xff]  ;;  %v715_v17 = vpack.c.bf16 %v291_v13, %v290_v12  ;;  %v292_v18 = vld [vmem:[#allocation6 + $0x20] sm:$0xff]  ;;  %v293_v19 = vld [vmem:[#allocation6 + $0x28] sm:$0xff] }
  0x5c   :  { %696 = vmatprep.subr.bf16.mxu1 %v873_v1  ;;  %v709_v20 = vpack.c.bf16 %v127_v16, %v124_v15  ;;  %v386_v21 = vld [vmem:[#allocation7] sm:$0xff]  ;;  %v387_v22 = vld [vmem:[#allocation7 + $0x8] sm:$0xff]  ;;  %v718_v23 = vpack.c.bf16 %v293_v19, %v292_v18  ;;  %v294_v24 = vld [vmem:[#allocation6 + $0x30] sm:$0xff] }
  0x5d   :  { %v295_v25 = vld [vmem:[#allocation6 + $0x38] sm:$0xff]  ;;  %v736_v26 = vpack.c.bf16 %v387_v22, %v386_v21  ;;  %v388_v27 = vld [vmem:[#allocation7 + $0x10] sm:$0xff]  ;;  %v296_v30 = vld [vmem:[#allocation6 + $0x40] sm:$0xff] }
  0x5e   :  { %674 = vmatpush1.bf16.msra.mxu0 %v673_v41  ;;  %v389_v28 = vld [vmem:[#allocation7 + $0x18] sm:$0xff]  ;;  %v721_v29 = vpack.c.bf16 %v295_v25, %v294_v24  ;;  %v297_v31 = vld [vmem:[#allocation6 + $0x48] sm:$0xff]  ;;  %v390_v33 = vld [vmem:[#allocation7 + $0x20] sm:$0xff] }
  0x5f   :  { %676 = vmatprep.subr.bf16.mxu0 %v675_v42  ;;  %698 = vmatpush3.bf16.msra.mxu1 %v697_v56  ;;  %v739_v32 = vpack.c.bf16 %v389_v28, %v388_v27  ;;  %v391_v34 = vld [vmem:[#allocation7 + $0x28] sm:$0xff]  ;;  %v724_v35 = vpack.c.bf16 %v297_v31, %v296_v30  ;;  %v298_v36 = vld [vmem:[#allocation6 + $0x50] sm:$0xff]  ;;  %v299_v37 = vld [vmem:[#allocation6 + $0x58] sm:$0xff] }
  0x60   :  { %699 = vmatprep.subr.bf16.mxu1 %v873_v1  ;;  %v742_v38 = vpack.c.bf16 %v391_v34, %v390_v33  ;;  %v392_v39 = vld [vmem:[#allocation7 + $0x30] sm:$0xff]  ;;  %v393_v40 = vld [vmem:[#allocation7 + $0x38] sm:$0xff]  ;;  %v727_v41 = vpack.c.bf16 %v299_v37, %v298_v36  ;;  %v301_v42 = vld [vmem:[#allocation6 + $0x68] sm:$0xff] }
  0x61   :  { %v745_v43 = vpack.c.bf16 %v393_v40, %v392_v39  ;;  %v394_v44 = vld [vmem:[#allocation7 + $0x40] sm:$0xff]  ;;  %v395_v45 = vld [vmem:[#allocation7 + $0x48] sm:$0xff]  ;;  %v396_v48 = vld [vmem:[#allocation7 + $0x50] sm:$0xff] }
  0x62   :  { %678 = vmatpush1.bf16.msra.mxu0 %v677_v50  ;;  %v748_v47 = vpack.c.bf16 %v395_v45, %v394_v44  ;;  %v397_v49 = vld [vmem:[#allocation7 + $0x58] sm:$0xff]  ;;  %v399_v52 = vld [vmem:[#allocation7 + $0x68] sm:$0xff]  ;;  %v302_v54 = vld [vmem:[#allocation6 + $0x70] sm:$0xff] }
  0x63   :  { %680 = vmatprep.subr.bf16.mxu0 %v679_v51  ;;  %701 = vmatpush3.bf16.msra.mxu1 %v700_v63  ;;  %v751_v50 = vpack.c.bf16 %v397_v49, %v396_v48  ;;  %v398_v51 = vld [vmem:[#allocation7 + $0x60] sm:$0xff]  ;;  %v303_v55 = vld [vmem:[#allocation6 + $0x78] sm:$0xff]  ;;  %v400_v57 = vld [vmem:[#allocation7 + $0x70] sm:$0xff] }
  0x64   :  { %702 = vmatprep.subr.bf16.mxu1 %v873_v1  ;;  %v754_v53 = vpack.c.bf16 %v399_v52, %v398_v51  ;;  %v733_v56 = vpack.c.bf16 %v303_v55, %v302_v54  ;;  %v401_v58 = vld [vmem:[#allocation7 + $0x78] sm:$0xff] }
  0x65   :  { %v128_v63 = vld [vmem:[%s1013_s2] sm:$0x7] }
  0x66   :  { %682 = vmatpush1.bf16.msra.mxu0 %v681_v59  ;;  %v757_v59 = vpack.c.bf16 %v401_v58, %v400_v57  ;;  %v497_v15 = vld [vmem:[%s1015_s4] ss:$0 sm:$0xff] }
  0x67   :  { %684 = vmatprep.subr.bf16.mxu0 %v683_v60  ;;  %704 = vmatpush3.bf16.msra.mxu1 %v703_v7  ;;  %v130_v60 = vlaneseq  ;;  %v498_v16 = vld [vmem:[%s1017_s6] ss:$0 sm:$0xff] }
  0x68   :  { %705 = vmatprep.subr.bf16.mxu1 %v873_v1 }
  0x69   :  { %v131_v61 = vshrl.u32 %v130_v60, 7 }
  0x6a   :  { %686 = vmatpush1.bf16.msra.mxu0 %v685_v4 }
  0x6b   :  { %711 = vmatprep.subr.bf16.mxu0 %v873_v1  ;;  %707 = vmatpush3.bf16.msra.mxu1 %v706_v14  ;;  %v132_v62 = vsub.s32 0, %v131_v61  ;;  %v136_v2 = vsub.s32 1, %v131_v61  ;;  %v140_v13 = vsub.s32 2, %v131_v61 }
  0x6c   :  { %708 = vmatprep.subr.bf16.mxu1 %v873_v1 }
  0x6d   :  { %210 = vmatmul.mubr.f32.vlgmr.msra.gmra.mrb[0].mxu0 %v972_v10  ;;  %v133_v3 = vrot.slane %v128_v63, %v132_v62  ;;  %v137_v4 = vrot.slane %v128_v63, %v136_v2  ;;  %v141_v14 = vrot.slane %v128_v63, %v140_v13 }
  0x6e   :  { %713 = vmatpush3.bf16.msra.mxu0 %v712_v11  ;;  %617 = vmatprep.mubr.msk.f32.mxu0 %vm874_vm0, %v872_v0 }
  0x6f   :  { %714 = vmatprep.subr.bf16.mxu0 %v873_v1  ;;  %710 = vmatpush3.bf16.msra.mxu1 %v709_v20 }
  0x70   :  { %735 = vmatprep.subr.bf16.mxu1 %v873_v1 }
  0x72   :  { %716 = vmatpush3.bf16.msra.mxu0 %v715_v17  ;;  %583 = vmatmul.mubr.f32.vlgmr.msra.gmra.mrb[0].mxu1 %v972_v10 }
  0x73   :  { %717 = vmatprep.subr.bf16.mxu0 %v873_v1  ;;  %737 = vmatpush3.bf16.msra.mxu1 %v736_v26 }
  0x74   :  { %652 = vmatprep.mubr.msk.f32.mxu1 %vm874_vm0, %v872_v0  ;;  %738 = vmatprep.subr.bf16.mxu1 %v873_v1  ;;  %v300_v0 = vld [vmem:[#allocation6 + $0x60] sm:$0xff] }
  0x75   :  { %v730_v46 = vpack.c.bf16 %v301_v42, %v300_v0 }
  0x76   :  { %719 = vmatpush3.bf16.msra.mxu0 %v718_v23 }
  0x77   :  { %720 = vmatprep.subr.bf16.mxu0 %v873_v1  ;;  %740 = vmatpush3.bf16.msra.mxu1 %v739_v32 }
  0x78   :  { %741 = vmatprep.subr.bf16.mxu1 %v873_v1 }
  0x7a   :  { %722 = vmatpush3.bf16.msra.mxu0 %v721_v29  ;;  %v485_v29 = vand.u32 127, %v130_v60 }
  0x7b   :  { %723 = vmatprep.subr.bf16.mxu0 %v873_v1  ;;  %743 = vmatpush3.bf16.msra.mxu1 %v742_v38 }
  0x7c   :  { %744 = vmatprep.subr.bf16.mxu1 %v873_v1  ;;  %vm486_vm1 = vcmp.eq.s32.totalorder %v485_v29, 0 }
  0x7e   :  { %725 = vmatpush3.bf16.msra.mxu0 %v724_v35 }
  0x7f   :  { %726 = vmatprep.subr.bf16.mxu0 %v873_v1  ;;  %746 = vmatpush3.bf16.msra.mxu1 %v745_v43 }
  0x80   :  { %747 = vmatprep.subr.bf16.mxu1 %v873_v1 }
  0x82   :  { %728 = vmatpush3.bf16.msra.mxu0 %v727_v41 }
  0x83   :  { %729 = vmatprep.subr.bf16.mxu0 %v873_v1  ;;  %749 = vmatpush3.bf16.msra.mxu1 %v748_v47 }
  0x84   :  { %750 = vmatprep.subr.bf16.mxu1 %v873_v1 }
  0x86   :  { %731 = vmatpush3.bf16.msra.mxu0 %v730_v46 }
  0x87   :  { %732 = vmatprep.subr.bf16.mxu0 %v873_v1  ;;  %752 = vmatpush3.bf16.msra.mxu1 %v751_v50 }
  0x88   :  { %753 = vmatprep.subr.bf16.mxu1 %v873_v1 }
  0x8a   :  { %734 = vmatpush3.bf16.msra.mxu0 %v733_v56 }
  0x8b   :  { %755 = vmatpush3.bf16.msra.mxu1 %v754_v53 }
  0x8c   :  { %756 = vmatprep.subr.bf16.mxu1 %v873_v1 }
  0x8f   :  { %758 = vmatpush3.bf16.msra.mxu1 %v757_v59 }
 0x140   :  { %v211_v5 = vpop.f32.mrb[0].mxu0 }
 0x141   :  { %v212_v1 = vadd.f32 %v211_v5, %v133_v3  ;;  %v213_v6 = vpop.f32.mrb[1].mxu0 }
 0x142   :  { %v214_v7 = vadd.f32 %v213_v6, %v137_v4 }
 0x143   :  { %v286_v8 = vmax.f32 %v212_v1, 0.0 }
 0x144   :  { %v287_v9 = vmax.f32 %v214_v7, 0.0 }
 0x145   :  { %618 = vmatmul.mubr.f32.vlgmr.msra.gmra.mrb[2].mxu0 %v286_v8  ;;  %v282_v11 = vpop.f32.mrb[0].mxu1 }
 0x146   :  { %653 = vmatmul.mubr.f32.vlgmr.msra.gmra.mrb[2].mxu1 %v287_v9  ;;  %v584_v12 = vpop.f32.mrb[1].mxu1  ;;  %v283_v18 = vadd.f32 %v282_v11, %v141_v14 }
 0x218   :  { %v377_v17 = vpop.f32.mrb[2].mxu0 }
 0x219   :  { %v378_v19 = vadd.f32 %v497_v15, %v377_v17  ;;  %v619_v20 = vpop.f32.mrb[3].mxu0  ;;  %v475_v21 = vpop.f32.mrb[2].mxu1 }
 0x21a   :  { %v476_v22 = vadd.f32 %v498_v16, %v475_v21  ;;  %v654_v23 = vpop.f32.mrb[3].mxu1 }
 0x21b   :  { %v381_v24 = vsub.f32 %v378_v19, %v283_v18 }
 0x21c   :  { %v479_v26 = vsub.f32 %v476_v22, %v972_v10 }
 0x21d   :  { %v382_v25 = vmul.f32 %v381_v24, %v381_v24 }
 0x21e   :  { %v480_v27 = vmul.f32 %v479_v26, %v479_v26 }
 0x21f   :  { %383 = vadd.xlane.f32.xlu0 %v382_v25 }
 0x223   :  { %481 = vadd.xlane.f32.xlu0 %v480_v27 }
 0x2ac   :  { %v384_v28 = vpop.xlane.xlu0 %383 }
 0x2ad   :  { %v385_v31 = vmul.f32 0.0625, %v384_v28 }
 0x2b0   :  { %v482_v30 = vpop.xlane.xlu0 %481 }
 0x2b1   :  { %v483_v32 = vmul.f32 0.0125, %v482_v30 }
 0x2b3   :  { %v487_v33 = vsel %vm486_vm1, %v385_v31, %v483_v32 }
 0x2b4   :  { %489 = vst.msk [vmem:[%s1018_s7] sm:$0xff] %vm488_vm2, %v487_v33 }
 0x2b5   :  { %494 = vsyncpa [#allocation3], 1 }
 0x2b6   :  { %495 = vsyncpa [#allocation5], 1 }
 0x2b7   :  { %496 = vsyncpa [#allocation8], 1 }

</bundles_post_ra>
